<compile_context>
chip_gen: v7x
topology: tpu7x:2x2x1
jax: 0.10.0
libtpu: 0.0.40
codegen_flags: <defaults>
</compile_context>

<pallas_src>
import functools

import numpy as np

import jax
import jax.numpy as jnp
from jax.experimental import pallas as pl
from jax.experimental.pallas import tpu as pltpu

NUM_ATTRIBUTES = [7, 3, 3, 4, 6, 3]          # == num_classes in the reference
NUM_HEADS = len(NUM_ATTRIBUTES)              # 6
MAXC = max(NUM_ATTRIBUTES)                   # 7
HEAD_STRIDE = 8                              # each head padded to 8 lanes
OUT_W = 128                                  # lane-dense output slab width
FEAT_DIM = 1536                              # effnet_b3 feature width
PER_STEP_BYTES = 8 * 1024 * 1024             # target streamed bytes per grid step


def _classifier_kernel(x_ref, w_ref, b_ref, sel_ref, out_ref, acc_ref, *, inv_hw):
    # x_ref:   (TB, C, TBLK, 128) or (TB, C, HW)  f32 streamed spatial tile
    # w_ref:   (C, 128)   f32 combined (backbone-stub proj @ packed head weights)
    # b_ref:   (1, 128)   f32 packed head biases; invalid lanes hold -1e30
    # sel_ref: (128, 128) f32 block-diagonal head-sum selector (8x8 ones blocks)
    # out_ref: (TB, 128)  f32 probability slab (written on last HW step only)
    # acc_ref: (TB, C)    f32 spatial-sum accumulator (VMEM scratch)
    hw_step = pl.program_id(1)

    @pl.when(hw_step == 0)
    def _init():
        acc_ref[...] = jnp.zeros_like(acc_ref)

    x = x_ref[...]                                    # native f32, no cast
    s = jnp.sum(x, axis=-1)                           # lane reduce
    if x.ndim == 4:                                   # lane-dense (TBLK,128) path
        s = jnp.sum(s, axis=-1)                       # -> (TB, C)
    acc_ref[...] += s

    @pl.when(hw_step == pl.num_programs(1) - 1)
    def _finalize():
        pooled = acc_ref[...] * inv_hw                # (TB, C) global avg pool
        # Dropout(p=0.2) is identity at inference; backbone stub + 6 heads are
        # one fused matmul against the pre-folded (C, 128) weight slab.
        logits = jnp.dot(pooled, w_ref[...],
                         preferred_element_type=jnp.float32) + b_ref[...]

        # Per-head softmax over the packed 128-lane slab.  Invalid lanes carry
        # a -1e30 bias, so exp underflows to exactly 0 and no mask is needed.
        # Softmax is invariant to subtracting any per-row constant >= the head
        # max, so one row-wise max suffices (heads whose logits underflow vs
        # the global max would be pathological for these magnitudes).
        m = jnp.max(logits, axis=1, keepdims=True)
        e = jnp.exp(logits - m)
        # Per-head sums broadcast into each head's lanes via one tiny matmul.
        denom = jnp.dot(e, sel_ref[...], preferred_element_type=jnp.float32)
        denom = jnp.where(denom > 0.0, denom, 1.0)    # guard padded lane groups
        out_ref[...] = e / denom                      # exact divide, lane-dense store


def _pick_tb(batch):
    """Batch-tile rows: multiple of 8, <=64, dividing B, leaving >=2 tiles."""
    best = None
    for t in range(8, min(batch // 2, 64) + 1, 8):
        if batch % t == 0:
            best = t
    return best if best is not None else batch       # small B: one full-extent tile


def _pick_tblk(nblk, tb, channels):
    """128-lane spatial blocks per grid step (divisor of nblk, 8-aligned)."""
    budget = max(1, PER_STEP_BYTES // (tb * channels * 128 * 4))
    if nblk <= budget:
        return nblk                                   # single HW step
    best = None
    for d in range(8, budget + 1, 8):
        if nblk % d == 0:
            best = d
    return best if best is not None else nblk         # fall back to full extent


def multi_label_classifier(x_nchw, wproj, w_all, b_all):
    B, C, H, W = x_nchw.shape
    hw = H * W

    # Fold the (linear) backbone-stub projection into the packed head weights:
    # pooled @ (Wproj @ Whead) == (pooled @ Wproj) @ Whead.
    w_comb = jnp.dot(wproj, w_all, precision=jax.lax.Precision.HIGHEST)  # (C, 128)

    # Static lane metadata: validity mask folded into the bias + head selector.
    lane = np.arange(OUT_W)
    valid = np.zeros((OUT_W,), np.bool_)
    for h, n_h in enumerate(NUM_ATTRIBUTES):
        valid[h * HEAD_STRIDE:h * HEAD_STRIDE + n_h] = True
    b_masked = jnp.where(jnp.asarray(valid)[None, :], b_all, jnp.float32(-1e30))
    sel = jnp.asarray(
        (lane[:, None] // HEAD_STRIDE) == (lane[None, :] // HEAD_STRIDE),
        dtype=jnp.float32)                            # (128, 128) block-diagonal

    tb = _pick_tb(B)

    if hw % 128 == 0:
        # Lane-dense streamed layout: contiguous (free) reshape, no pad, no cast.
        nblk = hw // 128
        x = x_nchw.reshape(B, C, nblk, 128)
        tblk = _pick_tblk(nblk, tb, C)
        grid = (B // tb, nblk // tblk)
        x_spec = pl.BlockSpec((tb, C, tblk, 128), lambda b, k: (b, 0, k, 0))
        block_bytes = tb * C * tblk * 128 * 4
    else:
        # TODO(synk): odd spatial sizes (hw % 128 != 0) fall back to a single
        # full-extent spatial block instead of in-kernel tail masking.
        x = x_nchw.reshape(B, C, hw)
        grid = (B // tb, 1)
        x_spec = pl.BlockSpec((tb, C, hw), lambda b, k: (b, 0, 0))
        block_bytes = tb * C * hw * 4

    # v7x: shard the batch axis across both TensorCores when there are >= 2
    # batch tiles; elsewhere plain PARALLEL (single-TC v5e/v6e, megacore v4/v5p).
    kind = jax.devices()[0].device_kind.lower()
    if "7" in kind and grid[0] >= 2:
        batch_sem = pltpu.CORE_PARALLEL
    else:
        batch_sem = pltpu.PARALLEL

    # Double-buffered streamed input + tiny resident weights/output headroom.
    vmem_limit = int(max(32 * 1024 * 1024, 2 * block_bytes + 8 * 1024 * 1024))

    kernel = functools.partial(_classifier_kernel, inv_hw=1.0 / float(hw))

    slab = pl.pallas_call(
        kernel,
        out_shape=jax.ShapeDtypeStruct((B, OUT_W), jnp.float32),
        grid=grid,
        in_specs=[
            x_spec,
            # Tiny weights: constant index_map -> stay resident in VMEM.
            pl.BlockSpec((C, OUT_W), lambda b, k: (0, 0)),
            pl.BlockSpec((1, OUT_W), lambda b, k: (0, 0)),
            pl.BlockSpec((OUT_W, OUT_W), lambda b, k: (0, 0)),
        ],
        out_specs=pl.BlockSpec((tb, OUT_W), lambda b, k: (b, 0)),
        scratch_shapes=[pltpu.VMEM((tb, C), jnp.float32)],
        compiler_params=pltpu.CompilerParams(
            dimension_semantics=(batch_sem, pltpu.ARBITRARY),
            vmem_limit_bytes=vmem_limit,
        ),
    )(x, w_comb, b_masked, sel)

    # (B, 128) slab -> (B, 6, 8) -> (B, 6, 7) -> (B, 7, 6) == torch.stack(dim=2)
    packed = slab[:, :NUM_HEADS * HEAD_STRIDE]
    per_head = packed.reshape(B, NUM_HEADS, HEAD_STRIDE)[:, :, :MAXC]
    return jnp.transpose(per_head, (0, 2, 1))


def make_params(key, in_channels):
    """Deterministic parameter construction (synthetic, no checkpoint)."""
    k_proj, *k_heads = jax.random.split(key, 1 + 2 * NUM_HEADS)

    # Backbone stub projection: (C, 1536)
    wproj = jax.random.normal(k_proj, (in_channels, FEAT_DIM), jnp.float32) * 0.05

    # Six Linear(1536 -> n_h) heads packed at an 8-lane stride into one
    # lane-dense (1536, 128) weight / (1, 128) bias slab; padding is zero.
    w_all = jnp.zeros((FEAT_DIM, OUT_W), jnp.float32)
    b_all = jnp.zeros((1, OUT_W), jnp.float32)
    for h, n_h in enumerate(NUM_ATTRIBUTES):
        kw, kb = k_heads[2 * h], k_heads[2 * h + 1]
        w_h = jax.random.normal(kw, (FEAT_DIM, n_h), jnp.float32) * 0.02
        b_h = jax.random.normal(kb, (n_h,), jnp.float32) * 0.02
        w_all = w_all.at[:, h * HEAD_STRIDE:h * HEAD_STRIDE + n_h].set(w_h)
        b_all = b_all.at[0, h * HEAD_STRIDE:h * HEAD_STRIDE + n_h].set(b_h)
    return wproj, w_all, b_all


if __name__ == "__main__":
    key = jax.random.PRNGKey(0)
    k_x, k_p = jax.random.split(key)

    B, C, H, W = 2, 4, 16, 16
    x = jax.random.normal(k_x, (B, C, H, W), jnp.float32)
    wproj, w_all, b_all = make_params(k_p, C)

    out = jax.block_until_ready(multi_label_classifier(x, wproj, w_all, b_all))
    assert out.shape == (B, MAXC, NUM_HEADS), out.shape

    # Each head's valid probabilities sum to 1 (exact divide in the kernel).
    sums = jnp.sum(out, axis=1)                      # (B, NUM_HEADS)
    assert bool(jnp.all(jnp.abs(sums - 1.0) < 1e-4)), sums
    # Padded class slots are exactly zero (torch.cat filler semantics).
    for h, n_h in enumerate(NUM_ATTRIBUTES):
        assert bool(jnp.all(out[:, n_h:, h] == 0.0))

    # Pure-JAX reference of the same (stub-backbone) forward pass.
    pooled = jnp.mean(x.reshape(B, C, H * W), axis=2)
    feat = jnp.dot(pooled, wproj, precision=jax.lax.Precision.HIGHEST)
    heads = []
    for h, n_h in enumerate(NUM_ATTRIBUTES):
        w_h = w_all[:, h * HEAD_STRIDE:h * HEAD_STRIDE + n_h]
        b_h = b_all[0, h * HEAD_STRIDE:h * HEAD_STRIDE + n_h]
        logit = jnp.dot(feat, w_h, precision=jax.lax.Precision.HIGHEST) + b_h
        p = jax.nn.softmax(logit, axis=1)
        heads.append(jnp.pad(p, ((0, 0), (0, MAXC - n_h))))
    ref = jnp.stack(heads, axis=2)                   # (B, 7, 6)
    err = float(jnp.max(jnp.abs(out - ref)))
    assert err < 2e-3, err

    print("KERNEL_OK")
</pallas_src>

<mosaic_0001>
module attributes {stable_mosaic.version = 11 : i64} {
  func.func @_classifier_kernel(%arg0: i32, %arg1: i32, %arg2: memref<2x4x2x128xf32, #tpu.memory_space<vmem>>, %arg3: memref<4x128xf32, #tpu.memory_space<vmem>>, %arg4: memref<1x128xf32, #tpu.memory_space<vmem>>, %arg5: memref<128x128xf32, #tpu.memory_space<vmem>>, %arg6: memref<2x128xf32, #tpu.memory_space<vmem>>, %arg7: memref<2x4xf32, #tpu.memory_space<vmem>>) attributes {dimension_semantics = [#tpu.dimension_semantics<parallel>, #tpu.dimension_semantics<arbitrary>], iteration_bounds = array<i64: 1, 1>, scalar_prefetch = 0 : i64, scratch_operands = 1 : i64, tpu.core_type = #tpu.core_type<tc>, window_params = [{transform_indices = @transform_0, window_bounds = array<i64: 2, 4, 2, 128>}, {pipeline_mode = #tpu.pipeline_mode<synchronous>, transform_indices = @transform_1, window_bounds = array<i64: 4, 128>}, {pipeline_mode = #tpu.pipeline_mode<synchronous>, transform_indices = @transform_2, window_bounds = array<i64: 1, 128>}, {pipeline_mode = #tpu.pipeline_mode<synchronous>, transform_indices = @transform_3, window_bounds = array<i64: 128, 128>}, {transform_indices = @transform_4, window_bounds = array<i64: 2, 128>}]} {
    %c0_i32 = arith.constant 0 : i32
    %0 = arith.cmpi eq, %arg1, %c0_i32 : i32
    %1 = arith.extui %0 : i1 to i32
    %c0_i32_0 = arith.constant 0 : i32
    %2 = arith.cmpi ne, %1, %c0_i32_0 : i32
    scf.if %2 {
      %cst_11 = arith.constant 0.000000e+00 : f32
      %12 = vector.broadcast %cst_11 : f32 to vector<2x4xf32>
      %c0_12 = arith.constant 0 : index
      %c0_13 = arith.constant 0 : index
      %13 = vector.load %arg7[%c0_12, %c0_13] : memref<2x4xf32, #tpu.memory_space<vmem>>, vector<2x4xf32>
      tpu.vector_store %arg7[%c0_12, %c0_13], %12 {strides = array<i32>} : memref<2x4xf32, #tpu.memory_space<vmem>>, vector<2x4xf32>,
    } else {
    }
    %c0 = arith.constant 0 : index
    %c0_1 = arith.constant 0 : index
    %c0_2 = arith.constant 0 : index
    %c0_3 = arith.constant 0 : index
    %3 = vector.load %arg2[%c0, %c0_1, %c0_2, %c0_3] : memref<2x4x2x128xf32, #tpu.memory_space<vmem>>, vector<2x4x2x128xf32>
    %cst = arith.constant dense<0.000000e+00> : vector<2x4x2xf32>
    %4 = vector.multi_reduction <add>, %3, %cst [3] : vector<2x4x2x128xf32> to vector<2x4x2xf32>
    %cst_4 = arith.constant dense<0.000000e+00> : vector<2x4xf32>
    %5 = vector.multi_reduction <add>, %4, %cst_4 [2] : vector<2x4x2xf32> to vector<2x4xf32>
    %c0_5 = arith.constant 0 : index
    %c0_6 = arith.constant 0 : index
    %6 = vector.load %arg7[%c0_5, %c0_6] : memref<2x4xf32, #tpu.memory_space<vmem>>, vector<2x4xf32>
    %7 = arith.addf %6, %5 : vector<2x4xf32>
    %c0_7 = arith.constant 0 : index
    %c0_8 = arith.constant 0 : index
    %8 = vector.load %arg7[%c0_7, %c0_8] : memref<2x4xf32, #tpu.memory_space<vmem>>, vector<2x4xf32>
    tpu.vector_store %arg7[%c0_7, %c0_8], %7 {strides = array<i32>} : memref<2x4xf32, #tpu.memory_space<vmem>>, vector<2x4xf32>,
    %c0_i32_9 = arith.constant 0 : i32
    %9 = arith.cmpi eq, %arg1, %c0_i32_9 : i32
    %10 = arith.extui %9 : i1 to i32
    %c0_i32_10 = arith.constant 0 : i32
    %11 = arith.cmpi ne, %10, %c0_i32_10 : i32
    scf.if %11 {
      %c0_11 = arith.constant 0 : index
      %c0_12 = arith.constant 0 : index
      %12 = vector.load %arg7[%c0_11, %c0_12] : memref<2x4xf32, #tpu.memory_space<vmem>>, vector<2x4xf32>
      %cst_13 = arith.constant 3.906250e-03 : f32
      %13 = vector.broadcast %cst_13 : f32 to vector<2x4xf32>
      %14 = arith.mulf %12, %13 : vector<2x4xf32>
      %c0_14 = arith.constant 0 : index
      %c0_15 = arith.constant 0 : index
      %15 = vector.load %arg3[%c0_14, %c0_15] : memref<4x128xf32, #tpu.memory_space<vmem>>, vector<4x128xf32>
      %cst_16 = arith.constant dense<0.000000e+00> : vector<2x128xf32>
      %16 = tpu.matmul %14, %15, %cst_16 {dimension_numbers = #tpu.dot_dimension_numbers<[1], [0], [0], [1], [0, 0, 1, 1], [], []>} : vector<2x4xf32>, vector<4x128xf32>, vector<2x128xf32> -> vector<2x128xf32>
      %c0_17 = arith.constant 0 : index
      %c0_18 = arith.constant 0 : index
      %17 = vector.load %arg4[%c0_17, %c0_18] : memref<1x128xf32, #tpu.memory_space<vmem>>, vector<1x128xf32>
      %18 = vector.broadcast %17 : vector<1x128xf32> to vector<2x128xf32>
      %19 = arith.addf %16, %18 : vector<2x128xf32>
      %cst_19 = arith.constant dense<0xFF800000> : vector<2xf32>
      %20 = vector.multi_reduction <maximumf>, %19, %cst_19 [1] : vector<2x128xf32> to vector<2xf32>
      %21 = vector.shape_cast %20 : vector<2xf32> to vector<2x1xf32>
      %22 = vector.broadcast %21 : vector<2x1xf32> to vector<2x128xf32>
      %23 = arith.subf %19, %22 : vector<2x128xf32>
      %24 = math.exp %23 : vector<2x128xf32>
      %c0_20 = arith.constant 0 : index
      %c0_21 = arith.constant 0 : index
      %25 = vector.load %arg5[%c0_20, %c0_21] : memref<128x128xf32, #tpu.memory_space<vmem>>, vector<128x128xf32>
      %cst_22 = arith.constant dense<0.000000e+00> : vector<2x128xf32>
      %26 = tpu.matmul %24, %25, %cst_22 {dimension_numbers = #tpu.dot_dimension_numbers<[1], [0], [0], [1], [0, 0, 1, 1], [], []>} : vector<2x128xf32>, vector<128x128xf32>, vector<2x128xf32> -> vector<2x128xf32>
      %cst_23 = arith.constant 0.000000e+00 : f32
      %27 = vector.broadcast %cst_23 : f32 to vector<2x128xf32>
      %28 = arith.cmpf ogt, %26, %27 : vector<2x128xf32>
      %cst_24 = arith.constant 1.000000e+00 : f32
      %29 = vector.broadcast %cst_24 : f32 to vector<2x128xf32>
      %30 = arith.select %28, %26, %29 : vector<2x128xi1>, vector<2x128xf32>
      %31 = arith.divf %24, %30 : vector<2x128xf32>
      %c0_25 = arith.constant 0 : index
      %c0_26 = arith.constant 0 : index
      %32 = vector.load %arg6[%c0_25, %c0_26] : memref<2x128xf32, #tpu.memory_space<vmem>>, vector<2x128xf32>
      tpu.vector_store %arg6[%c0_25, %c0_26], %31 {strides = array<i32>} : memref<2x128xf32, #tpu.memory_space<vmem>>, vector<2x128xf32>,
    } else {
    }
    return
  }
  func.func @transform_0(%arg0: i32, %arg1: i32) -> (i32, i32, i32, i32) {
    %c0_i32 = arith.constant 0 : i32
    %c0_i32_0 = arith.constant 0 : i32
    %c0_i32_1 = arith.constant 0 : i32
    return %arg0, %c0_i32, %arg1, %c0_i32_0 : i32, i32, i32, i32
  }
  func.func @transform_1(%arg0: i32, %arg1: i32) -> (i32, i32) {
    %c0_i32 = arith.constant 0 : i32
    %c0_i32_0 = arith.constant 0 : i32
    %c0_i32_1 = arith.constant 0 : i32
    return %c0_i32, %c0_i32_0 : i32, i32
  }
  func.func @transform_2(%arg0: i32, %arg1: i32) -> (i32, i32) {
    %c0_i32 = arith.constant 0 : i32
    %c0_i32_0 = arith.constant 0 : i32
    %c0_i32_1 = arith.constant 0 : i32
    return %c0_i32, %c0_i32_0 : i32, i32
  }
  func.func @transform_3(%arg0: i32, %arg1: i32) -> (i32, i32) {
    %c0_i32 = arith.constant 0 : i32
    %c0_i32_0 = arith.constant 0 : i32
    %c0_i32_1 = arith.constant 0 : i32
    return %c0_i32, %c0_i32_0 : i32, i32
  }
  func.func @transform_4(%arg0: i32, %arg1: i32) -> (i32, i32) {
    %c0_i32 = arith.constant 0 : i32
    %c0_i32_0 = arith.constant 0 : i32
    return %arg0, %c0_i32 : i32, i32
  }
}

</mosaic_0001>

<bundles_post_ra>
// kernel: tpu_custom_call.1
= control target key start
LH: loop header
LB: loop body
LE: loop exit
PB: predicated region body
PF: predicated region fallthrough
CT: control target
= control target key end

     0   :  { %9 = vsyncpa [#allocation4], 0  ;;  %s679_s0 = inlined_call_operand.hbm [shape: f32[2,4,2,128], index: 0, kind: input, shape index: {}]   ;;  %s680_s1 = inlined_call_operand.hbm [shape: f32[4,128], index: 1, kind: input, shape index: {}]   ;;  %s681_s2 = inlined_call_operand.vmem [shape: f32[1,128], index: 2, kind: input, shape index: {}]   ;;  %s682_s3 = inlined_call_operand.hbm [shape: f32[128,128], index: 3, kind: input, shape index: {}]   ;;  %s683_s4 = inlined_call_operand.hbm [shape: f32[2,128], index: 4, kind: output, shape index: {}]  }
   0x1   :  { %10 = vsyncpa [#allocation7], 0 }
   0x2   :  { %11 = vsyncpa [#allocation5], 0  ;;  %s571_s15 = smov [#allocation6]   ;;  %s572_s17 = smov [#allocation3]  }
   0x3   :  { %s30_s16 = sshll.u32 %s571_s15, 4  ;;  %s17_s18 = sshll.u32 %s572_s17, 4  ;;  %s31_s16 = int_to_ptr.vmem [resolvable:$true] %s30_s16  ;;  %s607_s18 = int_to_ptr.vmem [resolvable:$true] %s17_s18 }
   0x4   :  { %s477_s21 = scalar_lea.hbm %s680_s1, 64 }
   0x5   :  { %p478_p0 = scmp.ne.s32.totalorder %s680_s1, %s477_s21  ;;  %p481_p1 = scmp.lt.u32.totalorder %s477_s21, %s680_s1 }
   0x7   :  { %p483_p2 = pnand %p481_p1, %p478_p0 }
   0x9   :  { %486 = shalt.err (!%p483_p2)
}
   0xa   :  { %s487_s26 = scalar_lea.vmem %s31_s16, 64  ;;  %p492_p4 = scmp.lt.s32.totalorder %s31_s16, %s31_s16 }
   0xb   :  { %p488_p3 = scmp.ne.s32.totalorder %s31_s16, %s487_s26  ;;  %p493_p5 = scmp.lt.s32.totalorder %s487_s26, %s487_s26 }
   0xd   :  { %p494_p6 = por %p493_p5, %p492_p4 }
   0xf   :  { %p495_p7 = pnand %p494_p6, %p488_p3 }
  0x11   :  { %498 = shalt.err (!%p495_p7)
}
  0x12   :  { %33 = dma.hbm_to_vmem [thread:$0]  %s680_s1, 64, %s31_s16, [#allocation7]  }
  0x13   :  { %s499_s5 = scalar_lea.hbm %s679_s0, 256 }
  0x14   :  { %p500_p8 = scmp.ne.s32.totalorder %s679_s0, %s499_s5  ;;  %p503_p9 = scmp.lt.u32.totalorder %s499_s5, %s679_s0 }
  0x16   :  { %p505_p10 = pnand %p503_p9, %p500_p8 }
  0x18   :  { %508 = shalt.err (!%p505_p10)
}
  0x19   :  { %s509_s10 = scalar_lea.vmem %s607_s18, 256  ;;  %p514_p12 = scmp.lt.s32.totalorder %s607_s18, %s607_s18 }
  0x1a   :  { %p510_p11 = scmp.ne.s32.totalorder %s607_s18, %s509_s10  ;;  %p515_p13 = scmp.lt.s32.totalorder %s509_s10, %s509_s10 }
  0x1c   :  { %p516_p0 = por %p515_p13, %p514_p12 }
  0x1e   :  { %p517_p1 = pnand %p516_p0, %p510_p11 }
  0x20   :  { %520 = shalt.err (!%p517_p1)
}
  0x21   :  { %s573_s1 = smov 32   ;;  %s574_s11 = smov 2  }
  0x22   :  { %23 = dma.hbm_to_vmem [thread:$0]  %s679_s0, 256, %s607_s18, [#allocation4], %s573_s1, %s573_s1, %s574_s11  }
  0x23   :  { %s575_s14 = smov [#allocation8]   ;;  %s521_s19 = scalar_lea.hbm %s682_s3, 2048 }
  0x24   :  { %s41_s15 = sshll.u32 %s575_s14, 4  ;;  %p522_p2 = scmp.ne.s32.totalorder %s682_s3, %s521_s19  ;;  %s42_s15 = int_to_ptr.vmem [resolvable:$true] %s41_s15 }
  0x25   :  { %p525_p3 = scmp.lt.u32.totalorder %s521_s19, %s682_s3 }
  0x27   :  { %p527_p4 = pnand %p525_p3, %p522_p2 }
  0x29   :  { %530 = shalt.err (!%p527_p4)
}
  0x2a   :  { %s531_s24 = scalar_lea.vmem %s42_s15, 2048  ;;  %p536_p6 = scmp.lt.s32.totalorder %s42_s15, %s42_s15 }
  0x2b   :  { %p532_p5 = scmp.ne.s32.totalorder %s42_s15, %s531_s24  ;;  %p537_p7 = scmp.lt.s32.totalorder %s531_s24, %s531_s24 }
  0x2d   :  { %p538_p8 = por %p537_p7, %p536_p6 }
  0x2f   :  { %p539_p9 = pnand %p538_p8, %p532_p5 }
  0x31   :  { %542 = shalt.err (!%p539_p9)
}
  0x32   :  { %s576_s0 = smov 128   ;;  %s577_s18 = smov 8  }
  0x33   :  { %47 = dma.hbm_to_vmem [thread:$0]  %s682_s3, 2048, %s42_s15, [#allocation7], %s576_s0, %s576_s0, %s577_s18  }
  0x34   :  { %565 = dma.done.wait [#allocation4], 256  }
  0x35   :  { %566 = vsyncadd [#allocation4], 4294967040 }
  0x36   :  { %567 = dma.done.wait [#allocation7], 2112  }
  0x37   :  { %568 = vsyncadd [#allocation7], 4294965184  ;;  %vm71_vm0 = vcmask 1041408   ;;  %v67_v0 = vld [vmem:[#allocation3 + $0x8] sm:$0x3]  ;;  %v104_v16 = vlaneseq  ;;  %vm138_vm1 = vcmask 1041409  }
  0x38   :  { %v63_v1 = vld [vmem:[#allocation3] sm:$0x3]  ;;  %v68_v2 = vld [vmem:[#allocation3 + $0xa] sm:$0x3]  ;;  %v84_v3 = vsel %vm71_vm0, %v67_v0, 0.0  ;;  %vm140_vm2 = vcmask 1042434  }
  0x39   :  { %v72_v4 = vsel %vm71_vm0, %v63_v1, 0.0  ;;  %v64_v5 = vld [vmem:[#allocation3 + $0x2] sm:$0x3]  ;;  %85 = vadd.xlane.f32.xlu1 %v84_v3  ;;  %v87_v6 = vsel %vm71_vm0, %v68_v2, 0.0  ;;  %v69_v8 = vld [vmem:[#allocation3 + $0xc] sm:$0x3] }
  0x3a   :  { %73 = vadd.xlane.f32.xlu0 %v72_v4  ;;  %v75_v7 = vsel %vm71_vm0, %v64_v5, 0.0  ;;  %v65_v9 = vld [vmem:[#allocation3 + $0x4] sm:$0x3]  ;;  %v90_v10 = vsel %vm71_vm0, %v69_v8, 0.0  ;;  %v70_v12 = vld [vmem:[#allocation3 + $0xe] sm:$0x3] }
  0x3b   :  { %v78_v11 = vsel %vm71_vm0, %v65_v9, 0.0  ;;  %v66_v13 = vld [vmem:[#allocation3 + $0x6] sm:$0x3]  ;;  %v93_v14 = vsel %vm71_vm0, %v70_v12, 0.0  ;;  %v105_v19 = vand.u32 127, %v104_v16  ;;  %v107_v20 = vshrl.u32 %v104_v16, 7 }
  0x3c   :  { %v81_v15 = vsel %vm71_vm0, %v66_v13, 0.0  ;;  %vm142_vm3 = vcmask 1043459   ;;  %vm149_vm4 = vcmask 11264   ;;  %vm61_vm5 = vcmask 25600   ;;  %v177_v45 = vld [vmem:[#allocation6] sm:$0xf] }
  0x3d   :  { %88 = vadd.xlane.f32.xlu1 %v87_v6  ;;  %v108_v23 = vsub.s32 %v105_v19, %v107_v20  ;;  %v578_v44 = vmov 0.0   ;;  %vm189_vm6 = vcmask 1043456   ;;  %vm579_vm7 = vmmov 0   ;;  %v269_v55 = vld [vmem:[#allocation8] sm:$0xff]  ;;  %v270_v56 = vld [vmem:[#allocation8 + $0x8] sm:$0xff]  ;;  %v271_v57 = vld [vmem:[#allocation8 + $0x10] sm:$0xff] }
  0x3e   :  { %76 = vadd.xlane.f32.xlu0 %v75_v7  ;;  %62 = vst.msk [vmem:[#allocation2] sm:$0x3] %vm61_vm5, %v578_v44  ;;  %398 = vmatprep.subr.mxu0 %v578_v44  ;;  %vm185_vm8 = vcmask 31744   ;;  %v580_v58 = vmov 0.0|0.0   ;;  %v439_v59 = vpack.c.bf16 %v270_v56, %v269_v55  ;;  %v272_v60 = vld [vmem:[#allocation8 + $0x18] sm:$0xff]  ;;  %v273_v62 = vld [vmem:[#allocation8 + $0x20] sm:$0xff] }
  0x3f   :  { %399 = vmatpush3.msk.msra.mxu0 %vm189_vm6, %v177_v45  ;;  %400 = vmatprep.mubr.msk.f32.mxu0 %vm579_vm7, %v578_v44  ;;  %v442_v61 = vpack.c.bf16 %v272_v60, %v271_v57  ;;  %v274_v63 = vld [vmem:[#allocation8 + $0x28] sm:$0xff]  ;;  %v275_v1 = vld [vmem:[#allocation8 + $0x30] sm:$0xff]  ;;  %v276_v2 = vld [vmem:[#allocation8 + $0x38] sm:$0xff] }
  0x40   :  { %435 = vmatprep.mubr.msk.f32.mxu1 %vm579_vm7, %v578_v44  ;;  %438 = vmatprep.subr.bf16.mxu1 %v580_v58  ;;  %v445_v0 = vpack.c.bf16 %v274_v63, %v273_v62  ;;  %v448_v3 = vpack.c.bf16 %v276_v2, %v275_v1  ;;  %v376_v4 = vld [vmem:[%s681_s2] ss:$0 sm:$0xff]  ;;  %v277_v9 = vld [vmem:[#allocation8 + $0x40] sm:$0xff]  ;;  %v279_v12 = vld [vmem:[#allocation8 + $0x50] sm:$0xff]  ;;  %s581_s2 = smov [#allocation9]  }
  0x41   :  { %91 = vadd.xlane.f32.xlu1 %v90_v10  ;;  %440 = vmatpush3.bf16.msra.mxu1 %v439_v59  ;;  %v278_v10 = vld [vmem:[#allocation8 + $0x48] sm:$0xff]  ;;  %v280_v13 = vld [vmem:[#allocation8 + $0x58] sm:$0xff]  ;;  %s366_s28 = sshll.u32 %s581_s2, 4  ;;  %s367_s28 = int_to_ptr.vmem [resolvable:$true] %s366_s28 }
  0x42   :  { %79 = vadd.xlane.f32.xlu0 %v78_v11  ;;  %441 = vmatprep.subr.bf16.mxu1 %v580_v58  ;;  %v451_v11 = vpack.c.bf16 %v278_v10, %v277_v9  ;;  %v282_v16 = vld [vmem:[#allocation8 + $0x68] sm:$0xff]  ;;  %v284_v19 = vld [vmem:[#allocation8 + $0x78] sm:$0xff]  ;;  %s543_s29 = scalar_lea.vmem %s367_s28, 32  ;;  %p548_p11 = scmp.lt.s32.totalorder %s367_s28, %s367_s28 }
  0x43   :  { %p544_p10 = scmp.ne.s32.totalorder %s367_s28, %s543_s29  ;;  %p549_p12 = scmp.lt.s32.totalorder %s543_s29, %s543_s29 }
  0x45   :  { %94 = vadd.xlane.f32.xlu1 %v93_v14  ;;  %v156_v50 = vld [vmem:[#allocation2] sm:$0x3]  ;;  %443 = vmatpush3.bf16.msra.mxu1 %v442_v61  ;;  %v454_v14 = vpack.c.bf16 %v280_v13, %v279_v12  ;;  %p550_p13 = por %p549_p12, %p548_p11 }
  0x46   :  { %82 = vadd.xlane.f32.xlu0 %v81_v15  ;;  %444 = vmatprep.subr.bf16.mxu1 %v580_v58  ;;  %v281_v15 = vld [vmem:[#allocation8 + $0x60] sm:$0xff] }
  0x47   :  { %p551_p0 = pnand %p550_p13, %p544_p10 }
  0x49   :  { %446 = vmatpush3.bf16.msra.mxu1 %v445_v0 }
  0x4a   :  { %447 = vmatprep.subr.bf16.mxu1 %v580_v58 }
  0x4d   :  { %449 = vmatpush3.bf16.msra.mxu1 %v448_v3 }
  0x4e   :  { %450 = vmatprep.subr.bf16.mxu1 %v580_v58 }
  0x51   :  { %452 = vmatpush3.bf16.msra.mxu1 %v451_v11 }
  0x52   :  { %453 = vmatprep.subr.bf16.mxu1 %v580_v58 }
  0x55   :  { %455 = vmatpush3.bf16.msra.mxu1 %v454_v14 }
  0x56   :  { %456 = vmatprep.subr.bf16.mxu1 %v580_v58 }
  0xc6   :  { %v86_v17 = vpop.xlane.xlu1 %85 }
  0xc7   :  { %v74_v18 = vpop.xlane.xlu0 %73  ;;  %v125_v30 = vrot.slane %v86_v17, %v108_v23  ;;  %v457_v17 = vpack.c.bf16 %v282_v16, %v281_v15 }
  0xc8   :  { %v109_v31 = vrot.slane %v74_v18, %v108_v23  ;;  %v283_v18 = vld [vmem:[#allocation8 + $0x70] sm:$0xff] }
  0xc9   :  { %458 = vmatpush3.bf16.msra.mxu1 %v457_v17  ;;  %v460_v20 = vpack.c.bf16 %v284_v19, %v283_v18 }
  0xca   :  { %v89_v21 = vpop.xlane.xlu1 %88  ;;  %459 = vmatprep.subr.bf16.mxu1 %v580_v58 }
  0xcb   :  { %v77_v22 = vpop.xlane.xlu0 %76  ;;  %v129_v26 = vrot.slane %v89_v21, %v108_v23 }
  0xcc   :  { %v113_v27 = vrot.slane %v77_v22, %v108_v23 }
  0xcd   :  { %v144_v34 = vsel %vm138_vm1, %v129_v26, %v125_v30  ;;  %461 = vmatpush3.bf16.msra.mxu1 %v460_v20 }
  0xce   :  { %v92_v24 = vpop.xlane.xlu1 %91  ;;  %v139_v35 = vsel %vm138_vm1, %v113_v27, %v109_v31 }
  0xcf   :  { %v80_v25 = vpop.xlane.xlu0 %79  ;;  %v133_v28 = vrot.slane %v92_v24, %v108_v23 }
  0xd0   :  { %v117_v29 = vrot.slane %v80_v25, %v108_v23 }
  0xd1   :  { %v145_v38 = vsel %vm140_vm2, %v133_v28, %v144_v34 }
  0xd2   :  { %v95_v32 = vpop.xlane.xlu1 %94  ;;  %v141_v39 = vsel %vm140_vm2, %v117_v29, %v139_v35 }
  0xd3   :  { %v83_v33 = vpop.xlane.xlu0 %82  ;;  %v137_v36 = vrot.slane %v95_v32, %v108_v23 }
  0xd4   :  { %v121_v37 = vrot.slane %v83_v33, %v108_v23 }
  0xd5   :  { %v146_v40 = vsel %vm142_vm3, %v137_v36, %v145_v38 }
  0xd6   :  { %v143_v41 = vsel %vm142_vm3, %v121_v37, %v141_v39  ;;  %v153_v42 = vsel %vm149_vm4, %v146_v40, 0.0 }
  0xd7   :  { %v150_v43 = vsel %vm149_vm4, %v143_v41, 0.0  ;;  %154 = vadd.xlane.f32.xlu1 %v153_v42 }
  0xd8   :  { %151 = vadd.xlane.f32.xlu0 %v150_v43 }
 0x164   :  { %v155_v46 = vpop.xlane.xlu1 %154 }
 0x165   :  { %v152_v47 = vpop.xlane.xlu0 %151  ;;  %v166_v48 = vrot.slane %v155_v46, %v108_v23 }
 0x166   :  { %v162_v49 = vrot.slane %v152_v47, %v108_v23 }
 0x168   :  { %v167_v51 = vsel %vm138_vm1, %v166_v48, %v162_v49 }
 0x169   :  { %v169_v52 = vadd.f32 %v167_v51, %v156_v50 }
 0x16b   :  { %171 = vst.msk [vmem:[#allocation2] sm:$0x3] %vm61_vm5, %v169_v52 }
 0x172   :  { %v175_v53 = vld [vmem:[#allocation2] sm:$0x3] }
 0x173   :  { %v176_v54 = vmul.f32 0.00390625, %v175_v53 }
 0x175   :  { %401 = vmatmul.mubr.msk.f32.vlgmr.msra.gmra.mrb[0].mxu0 %vm185_vm8, %v176_v54 }
 0x248   :  { %v259_v5 = vpop.f32.mrb[0].mxu0 }
 0x249   :  { %v260_v6 = vadd.f32 %v376_v4, %v259_v5  ;;  %v402_v7 = vpop.f32.mrb[1].mxu0 }
 0x24b   :  { %v263_v8 = vsel %vm71_vm0, %v260_v6, -inf }
 0x24c   :  { %264 = vmax.xlane.f32.xlu0 %v263_v8 }
 0x2d9   :  { %v265_v21 = vpop.xlane.xlu0 %264 }
 0x2da   :  { %v266_v22 = vsub.f32 %v260_v6, %v265_v21 }
 0x2dc   :  { %v267_v23 = vmul.f32 1.442695, %v266_v22 }
 0x2de   :  { %473 = vpow2.f32 %v267_v23 }
 0x2e8   :  { %v474_v24 = vpop.eup %473 }
 0x2e9   :  { %436 = vmatmul.mubr.f32.vlgmr.msra.gmra.mrb[0].mxu1 %v474_v24 }
 0x3bc   :  { %v351_v25 = vpop.f32.mrb[0].mxu1 }
 0x3bd   :  { %vm355_vm9 = vcmp.gt.f32.partialorder %v351_v25, 0.0  ;;  %v437_v26 = vpop.f32.mrb[1].mxu1 }
 0x3be   :  { %v356_v27 = vsel %vm355_vm9, %v351_v25, 1.0 }
 0x3bf   :  { %475 = vrcp.f32 %v356_v27 }
 0x3c9   :  { %v476_v28 = vpop.eup %475 }
 0x3ca   :  { %v358_v29 = vmul.f32 %v476_v28, %v474_v24 }
 0x3cc   :  { %359 = vst [vmem:[#allocation9] sm:$0x3] %v358_v29 }
 0x3cd   :  { %554 = shalt.err (!%p551_p0)
}
 0x3ce   :  { %s555_s6 = scalar_lea.hbm %s683_s4, 32 }
 0x3cf   :  { %p556_p1 = scmp.ne.s32.totalorder %s683_s4, %s555_s6  ;;  %p559_p2 = scmp.lt.u32.totalorder %s555_s6, %s683_s4 }
 0x3d1   :  { %p561_p3 = pnand %p559_p2, %p556_p1 }
 0x3d3   :  { %564 = shalt.err (!%p561_p3)
}
 0x3d4   :  { %369 = dma.vmem_to_hbm [thread:$0]  %s367_s28, 32, %s683_s4, [#allocation5]  }
 0x3d5   :  { %569 = dma.done.wait [#allocation5], 32  }
 0x3d6   :  { %570 = vsyncadd [#allocation5], 4294967264 }
 0x3d7   :  { %373 = vsyncpa [#allocation4], 1 }
 0x3d8   :  { %374 = vsyncpa [#allocation7], 1 }
 0x3d9   :  { %375 = vsyncpa [#allocation5], 1 }

</bundles_post_ra>
